<compile_context>
chip_gen: v7x
topology: tpu7x:2x2x1
jax: 0.10.0
libtpu: 0.0.40
codegen_flags: <defaults>
</compile_context>

<pallas_src>
import jax
import jax.numpy as jnp
from jax.experimental import pallas as pl
from jax.experimental.pallas import tpu as pltpu


def classifier_logreg_kernel(x_ref, w_ref, b_ref, out_ref):
    # x_ref:   (BLOCK_B, D_in)   tile of input embeddings
    # w_ref:   (D_in, N)         projection weight (pre-transposed, resident)
    # b_ref:   (1, N)            bias
    # out_ref: (BLOCK_B, N)      logits tile (lane/sublane-dense)
    out_ref[...] = (
        jnp.dot(x_ref[...], w_ref[...], preferred_element_type=jnp.float32)
        + b_ref[...]
    )


def classifier_logreg(seq_emb, weight, bias, *, block_b=128):
    """
    seq_emb: (B, D_in)  float32
    weight:  (N, D_in)  float32  (PyTorch nn.Linear layout)
    bias:    (N,)       float32
    returns: (B, N)     float32  logits = seq_emb @ weight.T + bias
    """
    B, D_in = seq_emb.shape
    N = weight.shape[0]

    # Batch tile: as large as allowed (amortizes per-grid-step overhead, fills
    # MXU sublanes), multiple of 8 when possible; pad B so the grid divides.
    block_b = min(block_b, B)
    if B >= 8:
        block_b = max(8, (block_b // 8) * 8)
    pad_b = (-B) % block_b
    x = seq_emb if pad_b == 0 else jnp.pad(seq_emb, ((0, pad_b), (0, 0)))
    Bp = B + pad_b

    w_t = weight.T.astype(jnp.float32)        # (D_in, N) — MXU-ready layout
    b2d = bias.reshape(1, N).astype(jnp.float32)

    grid = (Bp // block_b,)

    cost = pl.CostEstimate(
        flops=2 * Bp * D_in * N,
        transcendentals=0,
        bytes_accessed=4 * (Bp * D_in + D_in * N + N + Bp * N),
    )

    out = pl.pallas_call(
        classifier_logreg_kernel,
        out_shape=jax.ShapeDtypeStruct((Bp, N), jnp.float32),
        grid_spec=pltpu.PrefetchScalarGridSpec(
            num_scalar_prefetch=0,
            grid=grid,
            in_specs=[
                pl.BlockSpec((block_b, D_in), lambda i: (i, 0)),
                pl.BlockSpec((D_in, N), lambda i: (0, 0)),
                pl.BlockSpec((1, N), lambda i: (0, 0)),
            ],
            out_specs=pl.BlockSpec((block_b, N), lambda i: (i, 0)),
        ),
        compiler_params=pltpu.CompilerParams(
            dimension_semantics=("parallel",),
            vmem_limit_bytes=64 * 1024 * 1024,
        ),
        cost_estimate=cost,
    )(x, w_t, b2d)

    return out[:B] if pad_b else out


def classifier_logreg_ref(seq_emb, weight, bias):
    """Pure-JAX reference mirroring the PyTorch forward (log_reg path)."""
    return seq_emb @ weight.T + bias


if __name__ == "__main__":
    B, D_IN, N_CLASSES = 16, 32, 8

    key = jax.random.PRNGKey(0)
    k_x, k_w, k_b = jax.random.split(key, 3)

    seq_emb = jax.random.normal(k_x, (B, D_IN), dtype=jnp.float32)
    weight = jax.random.normal(k_w, (N_CLASSES, D_IN), dtype=jnp.float32) * 0.05
    bias = jax.random.normal(k_b, (N_CLASSES,), dtype=jnp.float32) * 0.01

    # block_b=8 -> grid=(2,) so the (parallel) batch grid axis is exercised.
    logits = classifier_logreg(seq_emb, weight, bias, block_b=8)
    logits = jax.block_until_ready(logits)

    ref = classifier_logreg_ref(seq_emb, weight, bias)
    assert logits.shape == (B, N_CLASSES)
    assert jnp.allclose(logits, ref, atol=1e-5, rtol=1e-5), "mismatch vs reference"

    print("KERNEL_OK")
</pallas_src>

<mosaic_0001>
module attributes {stable_mosaic.version = 11 : i64} {
  func.func @classifier_logreg_kernel(%arg0: i32, %arg1: memref<8x32xf32, #tpu.memory_space<vmem>>, %arg2: memref<32x8xf32, #tpu.memory_space<vmem>>, %arg3: memref<1x8xf32, #tpu.memory_space<vmem>>, %arg4: memref<8x8xf32, #tpu.memory_space<vmem>>) attributes {dimension_semantics = [#tpu.dimension_semantics<parallel>], iteration_bounds = array<i64: 2>, scalar_prefetch = 0 : i64, scratch_operands = 0 : i64, tpu.core_type = #tpu.core_type<tc>, window_params = [{transform_indices = @transform_0, window_bounds = array<i64: 8, 32>}, {pipeline_mode = #tpu.pipeline_mode<synchronous>, transform_indices = @transform_1, window_bounds = array<i64: 32, 8>}, {pipeline_mode = #tpu.pipeline_mode<synchronous>, transform_indices = @transform_2, window_bounds = array<i64: 1, 8>}, {transform_indices = @transform_3, window_bounds = array<i64: 8, 8>}]} {
    %c0 = arith.constant 0 : index
    %c0_0 = arith.constant 0 : index
    %0 = vector.load %arg1[%c0, %c0_0] : memref<8x32xf32, #tpu.memory_space<vmem>>, vector<8x32xf32>
    %c0_1 = arith.constant 0 : index
    %c0_2 = arith.constant 0 : index
    %1 = vector.load %arg2[%c0_1, %c0_2] : memref<32x8xf32, #tpu.memory_space<vmem>>, vector<32x8xf32>
    %cst = arith.constant dense<0.000000e+00> : vector<8x8xf32>
    %2 = tpu.matmul %0, %1, %cst {dimension_numbers = #tpu.dot_dimension_numbers<[1], [0], [0], [1], [0, 0, 1, 1], [], []>} : vector<8x32xf32>, vector<32x8xf32>, vector<8x8xf32> -> vector<8x8xf32>
    %c0_3 = arith.constant 0 : index
    %c0_4 = arith.constant 0 : index
    %3 = vector.load %arg3[%c0_3, %c0_4] : memref<1x8xf32, #tpu.memory_space<vmem>>, vector<1x8xf32>
    %4 = vector.broadcast %3 : vector<1x8xf32> to vector<8x8xf32>
    %5 = arith.addf %2, %4 : vector<8x8xf32>
    %c0_5 = arith.constant 0 : index
    %c0_6 = arith.constant 0 : index
    %6 = vector.load %arg4[%c0_5, %c0_6] : memref<8x8xf32, #tpu.memory_space<vmem>>, vector<8x8xf32>
    tpu.vector_store %arg4[%c0_5, %c0_6], %5 {strides = array<i32>} : memref<8x8xf32, #tpu.memory_space<vmem>>, vector<8x8xf32>,
    return
  }
  func.func @transform_0(%arg0: i32) -> (i32, i32) {
    %c0_i32 = arith.constant 0 : i32
    %c0_i32_0 = arith.constant 0 : i32
    return %arg0, %c0_i32 : i32, i32
  }
  func.func @transform_1(%arg0: i32) -> (i32, i32) {
    %c0_i32 = arith.constant 0 : i32
    %c0_i32_0 = arith.constant 0 : i32
    %c0_i32_1 = arith.constant 0 : i32
    return %c0_i32, %c0_i32_0 : i32, i32
  }
  func.func @transform_2(%arg0: i32) -> (i32, i32) {
    %c0_i32 = arith.constant 0 : i32
    %c0_i32_0 = arith.constant 0 : i32
    %c0_i32_1 = arith.constant 0 : i32
    return %c0_i32, %c0_i32_0 : i32, i32
  }
  func.func @transform_3(%arg0: i32) -> (i32, i32) {
    %c0_i32 = arith.constant 0 : i32
    %c0_i32_0 = arith.constant 0 : i32
    return %arg0, %c0_i32 : i32, i32
  }
}

</mosaic_0001>

<bundles_post_ra>
// kernel: tpu_custom_call.1
= control target key start
LH: loop header
LB: loop body
LE: loop exit
PB: predicated region body
PF: predicated region fallthrough
CT: control target
= control target key end

     0   :  { %8 = vsyncpa [#allocation3], 0  ;;  %s933_s0 = inlined_call_operand.hbm [shape: f32[16,32], index: 0, kind: input, shape index: {}]   ;;  %s934_s1 = inlined_call_operand.hbm [shape: f32[32,8], index: 1, kind: input, shape index: {}]   ;;  %s935_s2 = inlined_call_operand.hbm [shape: f32[1,8], index: 2, kind: input, shape index: {}]   ;;  %s936_s3 = inlined_call_operand.hbm [shape: f32[16,8], index: 3, kind: output, shape index: {}]  }
   0x1   :  { %10 = vsyncpa [#allocation3 + $0x1], 0 }
   0x2   :  { %11 = vsyncpa [#allocation6], 0 }
   0x3   :  { %12 = vsyncpa [#allocation4], 0 }
   0x4   :  { %14 = vsyncpa [#allocation4 + $0x1], 0  ;;  %s703_s12 = smov 0   ;;  %s705_s13 = smov 0  }
   0x5   :  { %s707_s14 = smov 0   ;;  %s709_s15 = smov 0  }
   0x6 LB: > { %s724_s16 = sadd.s32 4294967295, %s672_s15   ;;  %s404_s17 = sadd.s32 4294967294, %s672_s15   ;;  %s672_s15 = sphi %s709_s15, %s956_s15   ;;  %s668_s14 = sphi %s707_s14, %s955_s14   ;;  %s664_s13 = sphi %s705_s13, %s954_s13   ;;  %s660_s12 = sphi %s703_s12, %s953_s12  }
   0x7   : > { %p40_p0 = scmp.ne.s32.totalorder %s664_s13, %s660_s12  ;;  %p937_p1 = scmp.eq.s32.totalorder %s724_s16, 0 }
   0x8   : > { %p112_p3 = scmp.eq.s32.totalorder %s404_s17, 1  ;;  %p405_p5 = scmp.ge.s32.totalorder %s672_s15, 1 }
   0x9   : > { %p733_p4 = por %p937_p1, %p40_p0  ;;  %p119_p7 = scmp.lt.s32.totalorder %s672_s15, 3 }
   0xa   : > { %p738_p6 = por %p112_p3, %p40_p0  ;;  %s674_s21 = smov [#allocation5]  }
   0xb   : > { %s940_s18 = scalar_select %p733_p4, 1, 0 }
   0xc   : > { %s941_s19 = scalar_select %p738_p6, 1, 0 }
   0xd   : > { %p743_p8 = pnand %p405_p5, %p119_p7  ;;  %s131_s22 = sshll.u32 %s674_s21, 4  ;;  %s747_s22 = int_to_ptr.vmem [resolvable:$true] %s131_s22 }
   0xe   : > { %s675_s24 = smov [#allocation7]   ;;  %s516_s28 = scalar_lea.hbm %s934_s1, 512 }
   0xf   : > { %p456_p9 = pneg %p743_p8  ;;  %s145_s25 = sshll.u32 %s675_s24, 4  ;;  %s758_s25 = int_to_ptr.vmem [resolvable:$true] %s145_s25 }
  0x10   : > { %p517_p12 = scmp.ne.s32.totalorder %s934_s1, %s516_s28  ;;  %p523_p5 = scmp.lt.u32.totalorder %s516_s28, %s934_s1 }
  0x11   : > { %p754_p11 = pnand %p456_p9, %p937_p1 }
  0x13   : > { %p518_p13 = pneg %p754_p11 }
  0x15   : > { %p519_p0 = pnand %p518_p13, %p517_p12 }
  0x17   : > { %p520_p3 = pneg %p519_p0 }
  0x19   : > { %p525_p7 = pnand %p523_p5, %p520_p3 }
  0x1b   : > { %528 = shalt.err (!%p525_p7)
}
  0x1c   : > { %s529_s6 = scalar_lea.vmem %s747_s22, 512  ;;  %p537_p2 = scmp.lt.s32.totalorder %s747_s22, %s747_s22 }
  0x1d   : > { %p530_p9 = scmp.ne.s32.totalorder %s747_s22, %s529_s6  ;;  %p538_p12 = scmp.lt.s32.totalorder %s529_s6, %s529_s6 }
  0x1f   : > { %p532_p10 = pnand %p530_p9, %p518_p13  ;;  %p539_p0 = por %p538_p12, %p537_p2 }
  0x21   : > { %p533_p1 = pneg %p532_p10 }
  0x23   : > { %p540_p6 = pnand %p539_p0, %p533_p1 }
  0x25   : > { %543 = shalt.err (!%p540_p6)
}
  0x26   : > { %s676_s7 = smov 128   ;;  %s677_s8 = smov 8  }
  0x27   : > { %459 = dma.hbm_to_vmem [thread:$0]  (!%p754_p11), %s934_s1, 512, %s747_s22, [#allocation6], %s676_s7, %s676_s7, %s677_s8  }
  0x28   : > { %s544_s21 = scalar_lea.hbm %s935_s2, 16 }
  0x29   : > { %p545_p2 = scmp.ne.s32.totalorder %s935_s2, %s544_s21  ;;  %p551_p10 = scmp.lt.u32.totalorder %s544_s21, %s935_s2 }
  0x2b   : > { %p547_p1 = pnand %p545_p2, %p518_p13 }
  0x2d   : > { %p548_p6 = pneg %p547_p1 }
  0x2f   : > { %p553_p3 = pnand %p551_p10, %p548_p6 }
  0x31   : > { %556 = shalt.err (!%p553_p3)
}
  0x32   : > { %s557_s22 = scalar_lea.vmem %s758_s25, 16  ;;  %s564_s29 = scalar_lea.vmem %s758_s25, 32 }
  0x33   : > { %p558_p5 = scmp.ne.s32.totalorder %s758_s25, %s557_s22  ;;  %p565_p12 = scmp.lt.s32.totalorder %s758_s25, %s758_s25 }
  0x34   : > { %p566_p0 = scmp.lt.s32.totalorder %s564_s29, %s557_s22 }
  0x35   : > { %p560_p7 = pnand %p558_p5, %p518_p13 }
  0x36   : > { %p567_p2 = por %p566_p0, %p565_p12 }
  0x37   : > { %p561_p9 = pneg %p560_p7 }
  0x39   : > { %p568_p1 = pnand %p567_p2, %p561_p9 }
  0x3b   : > { %571 = shalt.err (!%p568_p1)
}
  0x3c   : > { %462 = dma.hbm_to_vmem [thread:$0]  (!%p754_p11), %s935_s2, 16, %s758_s25, [#allocation6]  }
  0x3d   : > { %s814_s5 = sadd.s32 1, %s672_s15   ;;  %s27_s23 = sadd.s32 1, %s668_s14 }
  0x3e   : > { %s24_s6 = ssub.s32 %s672_s15, %s814_s5  ;;  %p34_p13 = scmp.ne.s32.totalorder %s668_s14, %s664_s13 }
  0x3f   : > { %p25_p6 = scmp.eq.s32.totalorder %s24_s6, 0  ;;  %p35_p10 = scmp.eq.s32.totalorder %s672_s15, 0 }
  0x40   : > { %p944_p3 = scmp.eq.s32.totalorder %s724_s16, 1  ;;  %p473_p7 = scmp.lt.s32.totalorder %s672_s15, 2 }
  0x41   : > { %s830_s8 = scalar_select %p25_p6, %s668_s14, %s27_s23  }
  0x42   : > { %p824_p5 = por %p944_p3, %p34_p13  ;;  %p36_p9 = por %p35_p10, %p34_p13 }
  0x43   : > { %s156_s9 = sand.u32 1, %s668_s14   ;;  %s410_s25 = sshll.u32 %s672_s15, 7 }
  0x44   : > { %s945_s7 = scalar_select %p824_p5, 1, 0 }
  0x45   : > { %s409_s10 = sshll.u32 %s156_s9, 3  ;;  %s837_s21 = scalar_lea.hbm %s933_s0, %s410_s25 }
  0x46   : > { %s160_s24 = scalar_lea.vmem [#allocation2], %s409_s10  ;;  %p841_p11 = pnand %p473_p7, %p36_p9 }
  0x47   : > { %s167_s26 = sshll.u32 %s160_s24, 4  ;;  %s157_s28 = scalar_lea.sflag [#allocation3], %s156_s9  ;;  %s839_s26 = int_to_ptr.vmem [resolvable:$true] %s167_s26 }
  0x48   : > { %s572_s22 = scalar_lea.hbm %s837_s21, 128  ;;  %p574_p0 = pneg %p841_p11 }
  0x49   : > { %p573_p12 = scmp.ne.s32.totalorder %s837_s21, %s572_s22  ;;  %s577_s4 = scalar_lea.hbm %s933_s0, 256 }
  0x4a   : > { %p578_p13 = scmp.lt.u32.totalorder %s837_s21, %s933_s0  ;;  %p579_p6 = scmp.lt.u32.totalorder %s577_s4, %s572_s22 }
  0x4b   : > { %p575_p2 = pnand %p574_p0, %p573_p12  ;;  %p581_p3 = scmp.lt.u32.totalorder %s572_s22, %s837_s21 }
  0x4c   : > { %p580_p10 = por %p579_p6, %p578_p13 }
  0x4d   : > { %p576_p1 = pneg %p575_p2 }
  0x4e   : > { %p582_p7 = por %p581_p3, %p580_p10 }
  0x50   : > { %p583_p9 = pnand %p582_p7, %p576_p1 }
  0x52   : > { %586 = shalt.err (!%p583_p9)
}
  0x53   : > { %s587_s9 = scalar_lea.vmem %s839_s26, 128  ;;  %s678_s10 = smov [#allocation2]  }
  0x54   : > { %p588_p12 = scmp.ne.s32.totalorder %s839_s26, %s587_s9  ;;  %s592_s25 = sshll.u32 %s678_s10, 4  ;;  %s593_s25 = int_to_ptr.vmem [resolvable:$false] %s592_s25 }
  0x55   : > { %s594_s11 = scalar_lea.vmem %s593_s25, 256  ;;  %p595_p4 = scmp.lt.s32.totalorder %s839_s26, %s593_s25 }
  0x56   : > { %p590_p2 = pnand %p588_p12, %p574_p0  ;;  %p596_p13 = scmp.lt.s32.totalorder %s594_s11, %s587_s9 }
  0x58   : > { %p591_p5 = pneg %p590_p2  ;;  %p597_p6 = por %p596_p13, %p595_p4 }
  0x5a   : > { %p598_p10 = pnand %p597_p6, %p591_p5 }
  0x5c   : > { %601 = shalt.err (!%p598_p10)
}
  0x5d   : > { %466 = dma.hbm_to_vmem [thread:$0]  (!%p841_p11), %s837_s21, 128, %s839_s26, %s157_s28  }
  0x5e   : > { %176 = sbr.rel (%p743_p8) target bundleno = 343 (0x157), region = 32  ;;  %s873_s17 = sand.u32 (!%p743_p8), 1, %s664_s13  }
  0x5f   : > { %s412_s24 = sshll.u32 (!%p743_p8), %s873_s17, 3  ;;  %s179_s22 = scalar_lea.sflag (!%p743_p8), [#allocation3], %s873_s17 }
  0x60   : > { %s182_s29 = scalar_lea.vmem (!%p743_p8), [#allocation2], %s412_s24  ;;  %p947_p4 = scmp.ne.s32.totalorder (!%p743_p8), %s940_s18, 0 }
  0x65   : > { %647 = dma.done.wait (%p947_p4), %s179_s22, 128  }
  0x66   : > { %649 = vsyncadd (%p947_p4), %s179_s22, 4294967168  ;;  %p948_p5 = scmp.eq.s32.totalorder %s724_s16, 0 }
  0x68   : > { %651 = dma.done.wait (%p948_p5), [#allocation6], 528   ;;  %p949_p11 = pmov %p948_p5 }
  0x69   : > { %v679_v0 = vmov 0.0|0.0   ;;  %vm680_vm0 = vmmov 0   ;;  %v681_v1 = vmov 0.0   ;;  %v214_v2 = vld [vmem:[#allocation5] sm:$0xff]  ;;  %v215_v3 = vld [vmem:[#allocation5 + $0x8] sm:$0xff]  ;;  %v216_v4 = vld [vmem:[#allocation5 + $0x10] sm:$0xff] }
  0x6a   : > { %653 = vsyncadd (%p949_p11), [#allocation6], 4294966768  ;;  %438 = vmatprep.subr.bf16.mxu0 %v679_v0  ;;  %435 = vmatprep.mubr.msk.f32.mxu0 %vm680_vm0, %v681_v1  ;;  %v439_v5 = vpack.c.bf16 %v215_v3, %v214_v2  ;;  %v217_v6 = vld [vmem:[#allocation5 + $0x18] sm:$0xff]  ;;  %vm225_vm1 = vcmask 261120   ;;  %v416_v9 = vld [vmem:[#allocation7] ss:$0 sm:$0xff] }
  0x6b   : > { %v442_v7 = vpack.c.bf16 %v217_v6, %v216_v4  ;;  %v213_v8 = vld [vmem:[%s182_s29] sm:$0xff]  ;;  %s419_s18 = sshll.u32 %s724_s16, 7  ;;  %s212_s20 = scalar_lea.vmem [#allocation8], %s412_s24  ;;  %vm299_vm2 = vcmask 64512  }
  0x6c   : > { %440 = vmatpush3.bf16.msra.mxu0 %v439_v5  ;;  %s315_s21 = sshll.u32 %s212_s20, 4  ;;  %s889_s28 = scalar_lea.hbm %s936_s3, %s419_s18  ;;  %s891_s21 = int_to_ptr.vmem [resolvable:$true] %s315_s21 }
  0x6d   : > { %441 = vmatprep.subr.bf16.mxu0 %v679_v0  ;;  %s302_s30 = scalar_lea.sflag [#allocation4], %s873_s17  ;;  %s602_s4 = scalar_lea.vmem %s891_s21, 128 }
  0x6e   : > { %p603_p8 = scmp.ne.s32.totalorder %s891_s21, %s602_s4  ;;  %p950_p0 = scmp.ne.s32.totalorder %s945_s7, 0 }
  0x6f   : > { %s682_s16 = smov [#allocation8]  }
  0x70   : > { %443 = vmatpush3.bf16.msra.mxu0 %v442_v7  ;;  %p604_p1 = pnand %p603_p8, %p950_p0  ;;  %s606_s23 = sshll.u32 %s682_s16, 4  ;;  %s607_s23 = int_to_ptr.vmem [resolvable:$false] %s606_s23 }
  0x71   : > { %s608_s6 = scalar_lea.vmem %s607_s23, 256  ;;  %p609_p7 = scmp.lt.s32.totalorder %s891_s21, %s607_s23 }
  0x72   : > { %p605_p3 = pneg %p604_p1  ;;  %p610_p9 = scmp.lt.s32.totalorder %s608_s6, %s602_s4 }
  0x73   : > { %436 = vmatmul.mubr.msk.f32.vlgmr.msra.gmra.mrb[0].mxu0 %vm225_vm1, %v213_v8 }
  0x74   : > { %p611_p12 = por %p610_p9, %p609_p7 }
  0x76   : > { %p612_p2 = pnand %p611_p12, %p605_p3 }
 0x146   : > { %v295_v10 = vpop.f32.mrb[0].mxu0 }
 0x147   : > { %v296_v11 = vadd.f32 %v416_v9, %v295_v10  ;;  %v437_v12 = vpop.f32.mrb[1].mxu0 }
 0x149   : > { %300 = vst.msk [vmem:[%s212_s20] sm:$0xff] %vm299_vm2, %v296_v11 }
 0x14a   : > { %615 = shalt.err (!%p612_p2)
}
 0x14b   : > { %s616_s9 = scalar_lea.hbm %s889_s28, 128  ;;  %s620_s11 = scalar_lea.hbm %s936_s3, 256 }
 0x14c   : > { %p617_p13 = scmp.ne.s32.totalorder %s889_s28, %s616_s9  ;;  %p621_p4 = scmp.lt.u32.totalorder %s889_s28, %s936_s3 }
 0x14d   : > { %p622_p5 = scmp.lt.u32.totalorder %s620_s11, %s616_s9  ;;  %p624_p8 = scmp.lt.u32.totalorder %s616_s9, %s889_s28 }
 0x14e   : > { %p618_p6 = pnand %p617_p13, %p950_p0 }
 0x14f   : > { %p623_p11 = por %p622_p5, %p621_p4 }
 0x150   : > { %p619_p10 = pneg %p618_p6 }
 0x151   : > { %p625_p1 = por %p624_p8, %p623_p11 }
 0x153   : > { %p626_p3 = pnand %p625_p1, %p619_p10 }
 0x155   : > { %629 = shalt.err (!%p626_p3)
}
 0x156   : > { %454 = dma.vmem_to_hbm [thread:$0]  (%p950_p0), %s891_s21, 128, %s889_s28, %s302_s30  }
 0x157 PF: > { %s327_s22 = sand.u32 1, %s660_s12   ;;  %p951_p7 = scmp.ne.s32.totalorder %s941_s19, 0 }
 0x158   : > { %p952_p9 = scmp.ge.s32.totalorder %s672_s15, 2  ;;  %s328_s29 = scalar_lea.sflag [#allocation4], %s327_s22 }
 0x15a   : > { %p468_p12 = pnand %p952_p9, %p951_p7 }
 0x15c   : > { %655 = dma.done.wait (!%p468_p12), %s328_s29, 128  }
 0x15d   : > { %657 = vsyncadd (!%p468_p12), %s328_s29, 4294967168  ;;  %p17_p2 = scmp.ge.s32.totalorder %s814_s5, 4   ;;  %s953_s12 = smov %s664_s13 }
 0x15e   : > { %s954_s13 = smov %s668_s14  ;;  %s955_s14 = smov %s830_s8 }
 0x15f   : > { %s956_s15 = smov %s814_s5  ;;  %19 = sbr.rel (!%p17_p2) target bundleno = 6 (0x6), region = 85 }
 0x166   :  { %333 = vsyncpa [#allocation3], 1 }
 0x167   :  { %335 = vsyncpa [#allocation3 + $0x1], 1 }
 0x168   :  { %336 = vsyncpa [#allocation6], 1 }
 0x169   :  { %337 = vsyncpa [#allocation4], 1 }
 0x16a   :  { %339 = vsyncpa [#allocation4 + $0x1], 1 }

</bundles_post_ra>
